<compile_context>
chip_gen: v5e
topology: v5e:2x2
jax: 0.10.0
libtpu: 0.0.40
codegen_flags: <defaults>
</compile_context>

<pallas_src>
from functools import partial

import jax
import jax.numpy as jnp
from jax import lax
from jax.experimental import pallas as pl
from jax.experimental.pallas import tpu as pltpu


def _label_smoothing_partial_kernel(
    x_ref, tgt_ref, out_ref, *, confidence, smoothing, n_valid, tile_n
):
    pid = pl.program_id(0)

    x = x_ref[...].astype(jnp.float32)  # (TILE_N, C); upcast if bf16
    tgt = tgt_ref[...]                  # (TILE_N, 1) int32
    tn, c = x.shape

    # Row-wise reductions directly on x (no full logprobs / shifted temporary):
    #   logprobs = x - lse  with  lse = m + log(sum(exp(x - m)))
    m = jnp.max(x, axis=-1, keepdims=True)                                # (TN,1)
    lse = m + jnp.log(jnp.sum(jnp.exp(x - m), axis=-1, keepdims=True))    # (TN,1)
    sum_x = jnp.sum(x, axis=-1, keepdims=True)                            # (TN,1)

    # Gather x[row, target[row]] via (1, C) iota broadcast + single select
    # (VPU + XLU; deliberately kept off the MXU).
    col_ids = lax.broadcasted_iota(jnp.int32, (1, c), 1)                  # (1,C)
    gathered = jnp.sum(
        jnp.where(col_ids == tgt, x, 0.0), axis=-1, keepdims=True
    )                                                                     # (TN,1)

    nll = lse - gathered                       # -logprobs[target]
    smooth = lse - sum_x * (1.0 / c)           # -mean(logprobs, axis=-1)
    per_row = confidence * nll + smoothing * smooth                       # (TN,1)

    # Mask rows past the true N: the ragged last block's tail rows contain
    # unspecified data (no wrapper-side padding), select drops them exactly.
    row_ids = lax.broadcasted_iota(jnp.int32, (tn, 1), 0) + pid * tile_n
    per_row = jnp.where(row_ids < n_valid, per_row, 0.0)

    s = jnp.sum(per_row)  # partial sum for this row tile (scalar)

    # Lane-dense (8, 128) output block: broadcast the partial sum; the wrapper
    # reads a single element per tile (exact, one broadcast per grid step).
    out_ref[...] = jnp.full((8, 128), s, dtype=jnp.float32)


def _vmem_capacity_bytes():
    try:
        return int(pltpu.get_tpu_info().vmem_capacity_bytes)
    except Exception:
        return 64 * 1024 * 1024  # conservative: v7x per-TC VMEM


def _per_row_vmem_bytes(c, itemsize):
    # x: 2 pipeline buffers * C * itemsize
    # target: 2 buffers * 128 lanes * 4 B  ((tile_n,1) int32 lane-pads to 128)
    # f32 temporaries: ~3 * C * 4 (x upcast, exp input, one-hot select)
    return 2 * c * itemsize + 2 * 128 * 4 + 3 * c * 4


def _choose_tile_n(n, c, itemsize, vmem_budget):
    per_row = _per_row_vmem_bytes(c, itemsize)
    target_x_block_bytes = 4 * 1024 * 1024  # ~85%+ of HBM roofline per measurements
    tile = min(target_x_block_bytes // max(1, c * itemsize), vmem_budget // per_row)
    tile = max(8, (tile // 8) * 8)

    if n <= 8:
        return int(n)  # single full-array block (block dim == array dim)

    # Keep at least 2 row tiles when N allows (v7x has 2 TensorCores), and
    # never exceed N rounded down to a multiple of 8.
    half = max(8, (((n + 1) // 2) // 8) * 8)
    n_floor8 = max(8, (n // 8) * 8)
    return int(min(tile, half, n_floor8))


def label_smoothing_loss(x, target, smoothing=0.1):
    """x: (N, C) float32/bfloat16 logits; target: (N,) int class indices."""
    confidence = 1.0 - smoothing
    n, c = x.shape
    itemsize = jnp.dtype(x.dtype).itemsize

    vmem_cap = _vmem_capacity_bytes()
    vmem_budget = min(48 * 1024 * 1024, int(0.6 * vmem_cap))

    tile_n = _choose_tile_n(n, c, itemsize, vmem_budget)
    num_tiles = int(pl.cdiv(n, tile_n))

    tgt2d = target.astype(jnp.int32).reshape(n, 1)  # no padding of x or target

    est_vmem = tile_n * _per_row_vmem_bytes(c, itemsize) + 2 * 8 * 128 * 4
    vmem_limit = int(min(0.75 * vmem_cap, max(32 * 1024 * 1024, 2 * est_vmem)))

    kernel = partial(
        _label_smoothing_partial_kernel,
        confidence=confidence,
        smoothing=smoothing,
        n_valid=n,
        tile_n=tile_n,
    )

    cost = pl.CostEstimate(
        flops=8 * n * c,
        transcendentals=n * c + n,  # exp per element + log per row
        bytes_accessed=n * c * itemsize + n * 4 + num_tiles * 8 * 128 * 4,
    )

    partials = pl.pallas_call(
        kernel,
        out_shape=jax.ShapeDtypeStruct((num_tiles * 8, 128), jnp.float32),
        grid_spec=pl.GridSpec(
            grid=(num_tiles,),
            in_specs=[
                pl.BlockSpec((tile_n, c), lambda i: (i, 0)),
                pl.BlockSpec((tile_n, 1), lambda i: (i, 0)),
            ],
            out_specs=pl.BlockSpec((8, 128), lambda i: (i, 0)),
        ),
        compiler_params=pltpu.CompilerParams(
            dimension_semantics=("parallel",),
            vmem_limit_bytes=vmem_limit,
        ),
        cost_estimate=cost,
    )(x, tgt2d)

    # One partial sum per tile (row 0, lane 0 of each tile's (8,128) block).
    return jnp.sum(partials[0::8, 0]) / n


def _reference(x, target, smoothing=0.1):
    confidence = 1.0 - smoothing
    logprobs = jax.nn.log_softmax(x.astype(jnp.float32), axis=-1)
    nll = -jnp.take_along_axis(logprobs, target[:, None], axis=-1)[:, 0]
    smooth = -jnp.mean(logprobs, axis=-1)
    return jnp.mean(confidence * nll + smoothing * smooth)


if __name__ == "__main__":
    key = jax.random.PRNGKey(0)
    smoothing = 0.1

    # Case 1: small, evenly-divisible batch.
    k1x, k1t, k2x, k2t = jax.random.split(key, 4)
    N1, C1 = 8, 32
    x1 = jax.random.normal(k1x, (N1, C1), dtype=jnp.float32)
    t1 = jax.random.randint(k1t, (N1,), 0, C1, dtype=jnp.int32)
    loss1 = jax.block_until_ready(label_smoothing_loss(x1, t1, smoothing=smoothing))
    ref1 = _reference(x1, t1, smoothing=smoothing)
    assert jnp.allclose(loss1, ref1, atol=1e-5, rtol=1e-5), (loss1, ref1)

    # Case 2: ragged batch (exercises the unpadded partial last block + mask).
    N2, C2 = 13, 160
    x2 = jax.random.normal(k2x, (N2, C2), dtype=jnp.float32)
    t2 = jax.random.randint(k2t, (N2,), 0, C2, dtype=jnp.int32)
    loss2 = jax.block_until_ready(label_smoothing_loss(x2, t2, smoothing=smoothing))
    ref2 = _reference(x2, t2, smoothing=smoothing)
    assert jnp.allclose(loss2, ref2, atol=1e-5, rtol=1e-5), (loss2, ref2)

    print("KERNEL_OK")
</pallas_src>

<mosaic_0001>
module attributes {stable_mosaic.version = 11 : i64} {
  func.func @_label_smoothing_partial_kernel(%arg0: i32, %arg1: memref<8x32xf32, #tpu.memory_space<vmem>>, %arg2: memref<8x1xi32, #tpu.memory_space<vmem>>, %arg3: memref<8x128xf32, #tpu.memory_space<vmem>>) attributes {dimension_semantics = [#tpu.dimension_semantics<parallel>], iteration_bounds = array<i64: 1>, scalar_prefetch = 0 : i64, scratch_operands = 0 : i64, tpu.core_type = #tpu.core_type<tc>, window_params = [{transform_indices = @transform_0, window_bounds = array<i64: 8, 32>}, {transform_indices = @transform_1, window_bounds = array<i64: 8, 1>}, {transform_indices = @transform_2, window_bounds = array<i64: 8, 128>}]} {
    %c0 = arith.constant 0 : index
    %c0_0 = arith.constant 0 : index
    %0 = vector.load %arg1[%c0, %c0_0] : memref<8x32xf32, #tpu.memory_space<vmem>>, vector<8x32xf32>
    %c0_1 = arith.constant 0 : index
    %c0_2 = arith.constant 0 : index
    %1 = vector.load %arg2[%c0_1, %c0_2] : memref<8x1xi32, #tpu.memory_space<vmem>>, vector<8x1xi32>
    %cst = arith.constant dense<0xFF800000> : vector<8xf32>
    %2 = vector.multi_reduction <maximumf>, %0, %cst [1] : vector<8x32xf32> to vector<8xf32>
    %3 = vector.shape_cast %2 : vector<8xf32> to vector<8x1xf32>
    %4 = vector.broadcast %3 : vector<8x1xf32> to vector<8x32xf32>
    %5 = arith.subf %0, %4 : vector<8x32xf32>
    %6 = math.exp %5 : vector<8x32xf32>
    %cst_3 = arith.constant dense<0.000000e+00> : vector<8xf32>
    %7 = vector.multi_reduction <add>, %6, %cst_3 [1] : vector<8x32xf32> to vector<8xf32>
    %8 = vector.shape_cast %7 : vector<8xf32> to vector<8x1xf32>
    %9 = math.log %8 : vector<8x1xf32>
    %10 = arith.addf %3, %9 : vector<8x1xf32>
    %cst_4 = arith.constant dense<0.000000e+00> : vector<8xf32>
    %11 = vector.multi_reduction <add>, %0, %cst_4 [1] : vector<8x32xf32> to vector<8xf32>
    %12 = vector.shape_cast %11 : vector<8xf32> to vector<8x1xf32>
    %13 = tpu.iota {dimensions = array<i32: 1>} : vector<1x32xi32>
    %14 = vector.broadcast %13 : vector<1x32xi32> to vector<8x32xi32>
    %15 = vector.broadcast %1 : vector<8x1xi32> to vector<8x32xi32>
    %16 = arith.cmpi eq, %14, %15 : vector<8x32xi32>
    %cst_5 = arith.constant 0.000000e+00 : f32
    %17 = vector.broadcast %cst_5 : f32 to vector<8x32xf32>
    %18 = arith.select %16, %0, %17 : vector<8x32xi1>, vector<8x32xf32>
    %cst_6 = arith.constant dense<0.000000e+00> : vector<8xf32>
    %19 = vector.multi_reduction <add>, %18, %cst_6 [1] : vector<8x32xf32> to vector<8xf32>
    %20 = vector.shape_cast %19 : vector<8xf32> to vector<8x1xf32>
    %21 = arith.subf %10, %20 : vector<8x1xf32>
    %cst_7 = arith.constant 3.125000e-02 : f32
    %22 = vector.broadcast %cst_7 : f32 to vector<8x1xf32>
    %23 = arith.mulf %12, %22 : vector<8x1xf32>
    %24 = arith.subf %10, %23 : vector<8x1xf32>
    %cst_8 = arith.constant 0.899999976 : f32
    %25 = vector.broadcast %cst_8 : f32 to vector<8x1xf32>
    %26 = arith.mulf %25, %21 : vector<8x1xf32>
    %cst_9 = arith.constant 1.000000e-01 : f32
    %27 = vector.broadcast %cst_9 : f32 to vector<8x1xf32>
    %28 = arith.mulf %27, %24 : vector<8x1xf32>
    %29 = arith.addf %26, %28 : vector<8x1xf32>
    %30 = tpu.iota {dimensions = array<i32: 0>} : vector<8x1xi32>
    %c8_i32 = arith.constant 8 : i32
    %31 = arith.muli %arg0, %c8_i32 : i32
    %32 = vector.broadcast %31 : i32 to vector<8x1xi32>
    %33 = arith.addi %30, %32 : vector<8x1xi32>
    %c8_i32_10 = arith.constant 8 : i32
    %34 = vector.broadcast %c8_i32_10 : i32 to vector<8x1xi32>
    %35 = arith.cmpi slt, %33, %34 : vector<8x1xi32>
    %cst_11 = arith.constant 0.000000e+00 : f32
    %36 = vector.broadcast %cst_11 : f32 to vector<8x1xf32>
    %37 = arith.select %35, %29, %36 : vector<8x1xi1>, vector<8x1xf32>
    %38 = vector.shape_cast %37 : vector<8x1xf32> to vector<1x8x1xf32>
    %cst_12 = arith.constant dense<0.000000e+00> : vector<1xf32>
    %39 = vector.multi_reduction <add>, %38, %cst_12 [1, 2] : vector<1x8x1xf32> to vector<1xf32>
    %40 = vector.shape_cast %39 : vector<1xf32> to vector<1x1x1xf32>
    %41 = vector.extract %40[0, 0, 0] : f32 from vector<1x1x1xf32>
    %42 = vector.broadcast %41 : f32 to vector<8x128xf32>
    %c0_13 = arith.constant 0 : index
    %c0_14 = arith.constant 0 : index
    %43 = vector.load %arg3[%c0_13, %c0_14] : memref<8x128xf32, #tpu.memory_space<vmem>>, vector<8x128xf32>
    tpu.vector_store %arg3[%c0_13, %c0_14], %42 {strides = array<i32>} : memref<8x128xf32, #tpu.memory_space<vmem>>, vector<8x128xf32>,
    return
  }
  func.func @transform_0(%arg0: i32) -> (i32, i32) {
    %c0_i32 = arith.constant 0 : i32
    %c0_i32_0 = arith.constant 0 : i32
    return %arg0, %c0_i32 : i32, i32
  }
  func.func @transform_1(%arg0: i32) -> (i32, i32) {
    %c0_i32 = arith.constant 0 : i32
    %c0_i32_0 = arith.constant 0 : i32
    return %arg0, %c0_i32 : i32, i32
  }
  func.func @transform_2(%arg0: i32) -> (i32, i32) {
    %c0_i32 = arith.constant 0 : i32
    %c0_i32_0 = arith.constant 0 : i32
    return %arg0, %c0_i32 : i32, i32
  }
}

</mosaic_0001>

<bundles_post_ra>
// kernel: tpu_custom_call.1
= control target key start
LH: loop header
LB: loop body
LE: loop exit
PB: predicated region body
PF: predicated region fallthrough
CT: control target
= control target key end

     0   :  { %vm14_vm0 = vcmask 261120   ;;  %s147_s0 = inlined_call_operand.vmem [shape: f32[8,32], index: 0, kind: input, shape index: {}]   ;;  %s148_s1 = inlined_call_operand.vmem [shape: s32[8,1], index: 1, kind: input, shape index: {}]   ;;  %s149_s2 = inlined_call_operand.hbm [shape: f32[8,128], index: 2, kind: output, shape index: {}]  }
   0x1   :  { %v12_v0 = vld [vmem:[%s147_s0] sm:$0xff] }
   0x2   :  { %7 = vsyncpa [#allocation3], 0  ;;  %v15_v1 = vsel %vm14_vm0, %v12_v0, -inf  ;;  %v117_v2 = vmov 0   ;;  %v13_v3 = vld [vmem:[%s148_s1] sm:$0xff]  ;;  %v30_v9 = vlaneseq  ;;  %v27_v11 = vsel %vm14_vm0, %v12_v0, 0.0 }
   0x3   :  { %86 = vset.pattern.permute.xlu0 %v117_v2  ;;  %vm53_vm2 = vcmask 7168   ;;  %s118_s0 = smov [#allocation2]   ;;  %s73_s15 = sshll.u32 %s149_s2, 4  ;;  %s74_s15 = int_to_ptr.hbm [resolvable:$true] %s73_s15 }
   0x4   :  { %16 = vmax.xlane.f32.xlu0 %v15_v1  ;;  %v31_v10 = vand.u32 127, %v30_v9  ;;  %s71_s1 = sshll.u32 %s118_s0, 4  ;;  %s72_s1 = int_to_ptr.vmem [resolvable:$true] %s71_s1 }
  0x18   :  { %33 = vperm.xlu0 %86, %v13_v3  }
  0x77   :  { %v17_v4 = vpop.xlane.xlu0 %16 }
  0x78   :  { %v18_v5 = vsub.f32 %v12_v0, %v17_v4 }
  0x7a   :  { %v19_v6 = vmul.f32 1.442695, %v18_v5 }
  0x7c   :  { %87 = vpow2.f32 %v19_v6 }
  0x82   :  { %v88_v7 = vpop.eup %87 }
  0x83   :  { %v21_v8 = vsel %vm14_vm0, %v88_v7, 0.0 }
  0x84   :  { %22 = vadd.xlane.f32.xlu1 %v21_v8 }
  0x8a   :  { %v34_v12 = vpop.permute.xlu0 %33 }
  0x8b   :  { %vm35_vm1 = vcmp.eq.s32.totalorder %v31_v10, %v34_v12 }
  0x8c   :  { %28 = vadd.xlane.f32.xlu1 %v27_v11  ;;  %v36_v13 = vsel %vm35_vm1, %v12_v0, 0.0 }
  0x8d   :  { %v37_v14 = vsel %vm14_vm0, %v36_v13, 0.0 }
  0x8e   :  { %38 = vadd.xlane.f32.xlu2 %v37_v14 }
  0xf7   :  { %v23_v15 = vpop.xlane.xlu1 %22 }
  0xf8   :  { %89 = vlog2.f32 %v23_v15 }
  0xfe   :  { %v90_v16 = vpop.eup %89 }
  0xff   :  { %v25_v17 = vmul.f32 0.6931472, %v90_v16  ;;  %v29_v18 = vpop.xlane.xlu1 %28 }
 0x100   :  { %v41_v19 = vmul.f32 0.03125, %v29_v18 }
 0x101   :  { %v26_v20 = vadd.f32 %v25_v17, %v17_v4  ;;  %v39_v21 = vpop.xlane.xlu2 %38 }
 0x103   :  { %v42_v22 = vsub.f32 %v26_v20, %v41_v19  ;;  %v40_v23 = vsub.f32 %v26_v20, %v39_v21 }
 0x105   :  { %v44_v24 = vmul.f32 0.1, %v42_v22  ;;  %v43_v25 = vmul.f32 0.9, %v40_v23 }
 0x107   :  { %v45_v26 = vadd.f32 %v44_v24, %v43_v25 }
 0x109   :  { %v54_v27 = vsel %vm53_vm2, %v45_v26, 0.0 }
 0x10a   :  { %55 = vadd.xlane.f32.xlu2 %v54_v27 }
 0x17d   :  { %v56_v28 = vpop.xlane.xlu2 %55 }
 0x17e   :  { %v57_v29 = vrot.slane %v56_v28, 4 }
 0x180   :  { %v58_v30 = vadd.f32 %v57_v29, %v56_v28 }
 0x182   :  { %v59_v31 = vrot.slane %v58_v30, 2 }
 0x184   :  { %v60_v32 = vadd.f32 %v59_v31, %v58_v30 }
 0x186   :  { %v61_v33 = vrot.slane %v60_v32, 1 }
 0x188   :  { %v62_v34 = vadd.f32 %v61_v33, %v60_v32 }
 0x18a   :  { %82 = vpush %v62_v34 }
 0x1bb   :  { %s83_s16 = spop %82 }
 0x1bc   :  { %v64_v35 = vstv %s83_s16 }
 0x1bd   :  { %65 = vst [vmem:[#allocation2] sm:$0xff] %v64_v35 }
 0x1be   :  { %76 = dma.vmem_to_hbm [thread:$0]  %s72_s1, 128, %s74_s15, [#allocation3]  }
 0x1bf   :  { %115 = dma.done.wait [#allocation3], 128  }
 0x1c0   :  { %116 = vsyncadd [#allocation3], 4294967168 }
 0x1c1   :  { %81 = vsyncpa [#allocation3], 1 }

</bundles_post_ra>
